<compile_context>
chip_gen: v7x
topology: tpu7x:2x2x1
jax: 0.10.0
libtpu: 0.0.40
codegen_flags: <defaults>
</compile_context>

<pallas_src>
import functools

import jax
import jax.numpy as jnp
from jax.experimental import pallas as pl
from jax.experimental.pallas import tpu as pltpu


def dqn_kernel(x_ref, w1_ref, b1_ref, w2_ref, b2_ref, w3_ref, b3_ref, o_ref):
    x = x_ref[...]            # (TB, 4)   f32
    w1 = w1_ref[...]          # (4, 128)  f32

    # ---- Layer 1 on the VPU: x @ w1 with K=4 == 4 broadcast FMAs (MXU-free) ----
    h1 = (x[:, 0:1] * w1[0:1, :]
          + x[:, 1:2] * w1[1:2, :]
          + x[:, 2:3] * w1[2:3, :]
          + x[:, 3:4] * w1[3:4, :]
          + b1_ref[...])
    h1 = jnp.maximum(h1, 0.0)

    # ---- Layers 2 & 3 on the MXU: f32 operands, f32 accumulation ----
    h2 = jnp.dot(h1, w2_ref[...], preferred_element_type=jnp.float32) + b2_ref[...]
    h2 = jnp.maximum(h2, 0.0)

    out = jnp.dot(h2, w3_ref[...], preferred_element_type=jnp.float32) + b3_ref[...]

    # Narrow (TB, 2) store: negligible masked-store cost at this width and no
    # 64x padded writeback / post-call slice.
    o_ref[...] = out.astype(o_ref.dtype)


@functools.partial(jax.jit, static_argnames=("tb",))
def dqn_forward(x, params, *, tb=512):
    w1, b1, w2, b2, w3, b3 = params
    B, K = x.shape
    hidden = w1.shape[1]
    out_f = w3.shape[1]

    # Small-batch path: shrink the tile to round_up(B, 8) rather than padding B
    # up to a full 512-row tile; large batches keep the big tile.
    tb_eff = min(tb, ((B + 7) // 8) * 8)
    n_tiles = pl.cdiv(B, tb_eff)
    b_pad = n_tiles * tb_eff
    if b_pad != B:
        # NOTE: padded rows carry bias-propagated values through the ReLUs; they
        # are sliced off below and must never be reduced over before slicing.
        x = jnp.pad(x, ((0, b_pad - B), (0, 0)))

    const = lambda shape: pl.BlockSpec(shape, lambda i: (0, 0))

    flops = 2 * b_pad * (K * hidden + hidden * hidden + hidden * out_f)
    bytes_accessed = 4 * (b_pad * K + w1.size + b1.size + w2.size + b2.size
                          + w3.size + b3.size + b_pad * out_f)

    out = pl.pallas_call(
        dqn_kernel,
        out_shape=jax.ShapeDtypeStruct((b_pad, out_f), jnp.float32),
        grid_spec=pltpu.PrefetchScalarGridSpec(
            num_scalar_prefetch=0,
            grid=(n_tiles,),
            in_specs=[
                pl.BlockSpec((tb_eff, K), lambda i: (i, 0)),   # x: tiled over batch
                const(w1.shape), const(b1.shape),              # layer 1
                const(w2.shape), const(b2.shape),              # layer 2
                const(w3.shape), const(b3.shape),              # layer 3
            ],
            out_specs=pl.BlockSpec((tb_eff, out_f), lambda i: (i, 0)),
        ),
        compiler_params=pltpu.CompilerParams(
            dimension_semantics=("parallel",)),
        cost_estimate=pl.CostEstimate(
            flops=flops, transcendentals=0, bytes_accessed=bytes_accessed),
    )(x, w1, b1, w2, b2, w3, b3)

    return out[:B] if b_pad != B else out


def init_params(key):
    # Deterministic init mimicking torch.nn.Linear default: U(-1/sqrt(fan_in), +).
    def linear(key, fan_in, fan_out):
        kw, kb = jax.random.split(key)
        bound = 1.0 / jnp.sqrt(fan_in)
        w = jax.random.uniform(kw, (fan_in, fan_out), jnp.float32, -bound, bound)
        b = jax.random.uniform(kb, (1, fan_out), jnp.float32, -bound, bound)
        return w, b

    k1, k2, k3 = jax.random.split(key, 3)
    w1, b1 = linear(k1, 4, 128)
    w2, b2 = linear(k2, 128, 128)
    w3, b3 = linear(k3, 128, 2)
    return (w1, b1, w2, b2, w3, b3)


def ref_forward(x, params):
    w1, b1, w2, b2, w3, b3 = params
    h1 = jnp.maximum((x[:, :, None] * w1[None, :, :]).sum(axis=1) + b1, 0.0)
    h2 = jnp.maximum(jnp.dot(h1, w2, preferred_element_type=jnp.float32) + b2, 0.0)
    return jnp.dot(h2, w3, preferred_element_type=jnp.float32) + b3


if __name__ == "__main__":
    key = jax.random.PRNGKey(0)
    kp, kx, kb = jax.random.split(key, 3)
    params = init_params(kp)

    # Small deterministic example (single-state / eval path).
    B = 4
    x = jax.random.normal(kx, (B, 4), jnp.float32)
    out = jax.block_until_ready(dqn_forward(x, params))
    ref = ref_forward(x, params)
    assert out.shape == (B, 2)
    # Tolerance covers possible bf16-pass matmul precision in the XLA reference.
    assert jnp.allclose(out, ref, atol=1e-2, rtol=1e-2), float(
        jnp.max(jnp.abs(out - ref)))

    # Non-8-aligned tiny batch: pads only to 8 rows (not a full tile).
    out3 = jax.block_until_ready(dqn_forward(x[:3], params))
    assert out3.shape == (3, 2)
    assert jnp.allclose(out3, ref[:3], atol=1e-2, rtol=1e-2)

    # Replay-sized batch exercising the multi-tile (grid >= 2) pipelined path.
    xb = jax.random.normal(kb, (1024, 4), jnp.float32)
    outb = jax.block_until_ready(dqn_forward(xb, params))
    refb = ref_forward(xb, params)
    assert outb.shape == (1024, 2)
    assert jnp.allclose(outb, refb, atol=1e-2, rtol=1e-2)

    print("KERNEL_OK")
</pallas_src>

<mosaic_0001>
module attributes {stable_mosaic.version = 11 : i64} {
  func.func @dqn_kernel(%arg0: i32, %arg1: memref<8x4xf32, #tpu.memory_space<vmem>>, %arg2: memref<4x128xf32, #tpu.memory_space<vmem>>, %arg3: memref<1x128xf32, #tpu.memory_space<vmem>>, %arg4: memref<128x128xf32, #tpu.memory_space<vmem>>, %arg5: memref<1x128xf32, #tpu.memory_space<vmem>>, %arg6: memref<128x2xf32, #tpu.memory_space<vmem>>, %arg7: memref<1x2xf32, #tpu.memory_space<vmem>>, %arg8: memref<8x2xf32, #tpu.memory_space<vmem>>) attributes {dimension_semantics = [#tpu.dimension_semantics<parallel>], iteration_bounds = array<i64: 1>, scalar_prefetch = 0 : i64, scratch_operands = 0 : i64, tpu.core_type = #tpu.core_type<tc>, window_params = [{transform_indices = @transform_0, window_bounds = array<i64: 8, 4>}, {pipeline_mode = #tpu.pipeline_mode<synchronous>, transform_indices = @transform_1, window_bounds = array<i64: 4, 128>}, {pipeline_mode = #tpu.pipeline_mode<synchronous>, transform_indices = @transform_2, window_bounds = array<i64: 1, 128>}, {pipeline_mode = #tpu.pipeline_mode<synchronous>, transform_indices = @transform_3, window_bounds = array<i64: 128, 128>}, {pipeline_mode = #tpu.pipeline_mode<synchronous>, transform_indices = @transform_4, window_bounds = array<i64: 1, 128>}, {pipeline_mode = #tpu.pipeline_mode<synchronous>, transform_indices = @transform_5, window_bounds = array<i64: 128, 2>}, {pipeline_mode = #tpu.pipeline_mode<synchronous>, transform_indices = @transform_6, window_bounds = array<i64: 1, 2>}, {transform_indices = @transform_7, window_bounds = array<i64: 8, 2>}]} {
    %c0 = arith.constant 0 : index
    %c0_0 = arith.constant 0 : index
    %0 = vector.load %arg1[%c0, %c0_0] : memref<8x4xf32, #tpu.memory_space<vmem>>, vector<8x4xf32>
    %c0_1 = arith.constant 0 : index
    %c0_2 = arith.constant 0 : index
    %1 = vector.load %arg2[%c0_1, %c0_2] : memref<4x128xf32, #tpu.memory_space<vmem>>, vector<4x128xf32>
    %2 = vector.extract_strided_slice %0 {offsets = [0, 0], sizes = [8, 1], strides = [1, 1]} : vector<8x4xf32> to vector<8x1xf32>
    %3 = vector.extract_strided_slice %1 {offsets = [0, 0], sizes = [1, 128], strides = [1, 1]} : vector<4x128xf32> to vector<1x128xf32>
    %4 = vector.broadcast %2 : vector<8x1xf32> to vector<8x128xf32>
    %5 = vector.broadcast %3 : vector<1x128xf32> to vector<8x128xf32>
    %6 = arith.mulf %4, %5 : vector<8x128xf32>
    %7 = vector.extract_strided_slice %0 {offsets = [0, 1], sizes = [8, 1], strides = [1, 1]} : vector<8x4xf32> to vector<8x1xf32>
    %8 = vector.extract_strided_slice %1 {offsets = [1, 0], sizes = [1, 128], strides = [1, 1]} : vector<4x128xf32> to vector<1x128xf32>
    %9 = vector.broadcast %7 : vector<8x1xf32> to vector<8x128xf32>
    %10 = vector.broadcast %8 : vector<1x128xf32> to vector<8x128xf32>
    %11 = arith.mulf %9, %10 : vector<8x128xf32>
    %12 = arith.addf %6, %11 : vector<8x128xf32>
    %13 = vector.extract_strided_slice %0 {offsets = [0, 2], sizes = [8, 1], strides = [1, 1]} : vector<8x4xf32> to vector<8x1xf32>
    %14 = vector.extract_strided_slice %1 {offsets = [2, 0], sizes = [1, 128], strides = [1, 1]} : vector<4x128xf32> to vector<1x128xf32>
    %15 = vector.broadcast %13 : vector<8x1xf32> to vector<8x128xf32>
    %16 = vector.broadcast %14 : vector<1x128xf32> to vector<8x128xf32>
    %17 = arith.mulf %15, %16 : vector<8x128xf32>
    %18 = arith.addf %12, %17 : vector<8x128xf32>
    %19 = vector.extract_strided_slice %0 {offsets = [0, 3], sizes = [8, 1], strides = [1, 1]} : vector<8x4xf32> to vector<8x1xf32>
    %20 = vector.extract_strided_slice %1 {offsets = [3, 0], sizes = [1, 128], strides = [1, 1]} : vector<4x128xf32> to vector<1x128xf32>
    %21 = vector.broadcast %19 : vector<8x1xf32> to vector<8x128xf32>
    %22 = vector.broadcast %20 : vector<1x128xf32> to vector<8x128xf32>
    %23 = arith.mulf %21, %22 : vector<8x128xf32>
    %24 = arith.addf %18, %23 : vector<8x128xf32>
    %c0_3 = arith.constant 0 : index
    %c0_4 = arith.constant 0 : index
    %25 = vector.load %arg3[%c0_3, %c0_4] : memref<1x128xf32, #tpu.memory_space<vmem>>, vector<1x128xf32>
    %26 = vector.broadcast %25 : vector<1x128xf32> to vector<8x128xf32>
    %27 = arith.addf %24, %26 : vector<8x128xf32>
    %cst = arith.constant 0.000000e+00 : f32
    %28 = vector.broadcast %cst : f32 to vector<8x128xf32>
    %29 = arith.maximumf %27, %28 : vector<8x128xf32>
    %c0_5 = arith.constant 0 : index
    %c0_6 = arith.constant 0 : index
    %30 = vector.load %arg4[%c0_5, %c0_6] : memref<128x128xf32, #tpu.memory_space<vmem>>, vector<128x128xf32>
    %cst_7 = arith.constant dense<0.000000e+00> : vector<8x128xf32>
    %31 = tpu.matmul %29, %30, %cst_7 {dimension_numbers = #tpu.dot_dimension_numbers<[1], [0], [0], [1], [0, 0, 1, 1], [], []>} : vector<8x128xf32>, vector<128x128xf32>, vector<8x128xf32> -> vector<8x128xf32>
    %c0_8 = arith.constant 0 : index
    %c0_9 = arith.constant 0 : index
    %32 = vector.load %arg5[%c0_8, %c0_9] : memref<1x128xf32, #tpu.memory_space<vmem>>, vector<1x128xf32>
    %33 = vector.broadcast %32 : vector<1x128xf32> to vector<8x128xf32>
    %34 = arith.addf %31, %33 : vector<8x128xf32>
    %cst_10 = arith.constant 0.000000e+00 : f32
    %35 = vector.broadcast %cst_10 : f32 to vector<8x128xf32>
    %36 = arith.maximumf %34, %35 : vector<8x128xf32>
    %c0_11 = arith.constant 0 : index
    %c0_12 = arith.constant 0 : index
    %37 = vector.load %arg6[%c0_11, %c0_12] : memref<128x2xf32, #tpu.memory_space<vmem>>, vector<128x2xf32>
    %cst_13 = arith.constant dense<0.000000e+00> : vector<8x2xf32>
    %38 = tpu.matmul %36, %37, %cst_13 {dimension_numbers = #tpu.dot_dimension_numbers<[1], [0], [0], [1], [0, 0, 1, 1], [], []>} : vector<8x128xf32>, vector<128x2xf32>, vector<8x2xf32> -> vector<8x2xf32>
    %c0_14 = arith.constant 0 : index
    %c0_15 = arith.constant 0 : index
    %39 = vector.load %arg7[%c0_14, %c0_15] : memref<1x2xf32, #tpu.memory_space<vmem>>, vector<1x2xf32>
    %40 = vector.broadcast %39 : vector<1x2xf32> to vector<8x2xf32>
    %41 = arith.addf %38, %40 : vector<8x2xf32>
    %c0_16 = arith.constant 0 : index
    %c0_17 = arith.constant 0 : index
    %42 = vector.load %arg8[%c0_16, %c0_17] : memref<8x2xf32, #tpu.memory_space<vmem>>, vector<8x2xf32>
    tpu.vector_store %arg8[%c0_16, %c0_17], %41 {strides = array<i32>} : memref<8x2xf32, #tpu.memory_space<vmem>>, vector<8x2xf32>,
    return
  }
  func.func @transform_0(%arg0: i32) -> (i32, i32) {
    %c0_i32 = arith.constant 0 : i32
    %c0_i32_0 = arith.constant 0 : i32
    return %arg0, %c0_i32 : i32, i32
  }
  func.func @transform_1(%arg0: i32) -> (i32, i32) {
    %c0_i32 = arith.constant 0 : i32
    %c0_i32_0 = arith.constant 0 : i32
    %c0_i32_1 = arith.constant 0 : i32
    return %c0_i32, %c0_i32_0 : i32, i32
  }
  func.func @transform_2(%arg0: i32) -> (i32, i32) {
    %c0_i32 = arith.constant 0 : i32
    %c0_i32_0 = arith.constant 0 : i32
    %c0_i32_1 = arith.constant 0 : i32
    return %c0_i32, %c0_i32_0 : i32, i32
  }
  func.func @transform_3(%arg0: i32) -> (i32, i32) {
    %c0_i32 = arith.constant 0 : i32
    %c0_i32_0 = arith.constant 0 : i32
    %c0_i32_1 = arith.constant 0 : i32
    return %c0_i32, %c0_i32_0 : i32, i32
  }
  func.func @transform_4(%arg0: i32) -> (i32, i32) {
    %c0_i32 = arith.constant 0 : i32
    %c0_i32_0 = arith.constant 0 : i32
    %c0_i32_1 = arith.constant 0 : i32
    return %c0_i32, %c0_i32_0 : i32, i32
  }
  func.func @transform_5(%arg0: i32) -> (i32, i32) {
    %c0_i32 = arith.constant 0 : i32
    %c0_i32_0 = arith.constant 0 : i32
    %c0_i32_1 = arith.constant 0 : i32
    return %c0_i32, %c0_i32_0 : i32, i32
  }
  func.func @transform_6(%arg0: i32) -> (i32, i32) {
    %c0_i32 = arith.constant 0 : i32
    %c0_i32_0 = arith.constant 0 : i32
    %c0_i32_1 = arith.constant 0 : i32
    return %c0_i32, %c0_i32_0 : i32, i32
  }
  func.func @transform_7(%arg0: i32) -> (i32, i32) {
    %c0_i32 = arith.constant 0 : i32
    %c0_i32_0 = arith.constant 0 : i32
    return %arg0, %c0_i32 : i32, i32
  }
}

</mosaic_0001>

<bundles_post_ra>
// kernel: dqn_forward.1
= control target key start
LH: loop header
LB: loop body
LE: loop exit
PB: predicated region body
PF: predicated region fallthrough
CT: control target
= control target key end

     0   :  { %v437_v0 = vmov 0   ;;  %v438_v2 = vmov 2   ;;  %v439_v8 = vmov 0.0|0.0   ;;  %v440_v12 = vmov 1   ;;  %s614_s0 = inlined_call_operand.vmem [shape: f32[8,4], index: 0, kind: input, shape index: {}]   ;;  %s615_s3 = inlined_call_operand.vmem [shape: f32[128,128], index: 3, kind: input, shape index: {}]   ;;  %s616_s5 = inlined_call_operand.vmem [shape: f32[128,2], index: 5, kind: input, shape index: {}]   ;;  %s617_s1 = inlined_call_operand.vmem [shape: f32[4,128], index: 1, kind: input, shape index: {}]   ;;  %s618_s2 = inlined_call_operand.vmem [shape: f32[1,128], index: 2, kind: input, shape index: {}]   ;;  %s619_s4 = inlined_call_operand.vmem [shape: f32[1,128], index: 4, kind: input, shape index: {}]   ;;  %s620_s6 = inlined_call_operand.vmem [shape: f32[1,2], index: 6, kind: input, shape index: {}]   ;;  %s621_s7 = inlined_call_operand.vmem [shape: f32[8,2], index: 7, kind: output, shape index: {}]  }
   0x1   :  { %432 = vset.pattern.permute.xlu0 %v437_v0  ;;  %v26_v1 = vld [vmem:[%s614_s0] sm:$0xff]  ;;  %434 = vset.pattern.permute.xlu1 %v438_v2  ;;  %v78_v4 = vld [vmem:[%s615_s3 + $0x8] sm:$0xff]  ;;  %v79_v6 = vld [vmem:[%s615_s3 + $0x10] sm:$0xff]  ;;  %v441_v13 = vmov 3   ;;  %vm442_vm0 = vmmov 0   ;;  %v443_v20 = vmov 0.0   ;;  %v33_v52 = vlaneseq }
   0x2   :  { %v77_v3 = vld [vmem:[%s615_s3] sm:$0xff]  ;;  %30 = vperm.xlu0 %432, %v26_v1   ;;  %49 = vperm.xlu1 %434, %v26_v1   ;;  %v80_v7 = vld [vmem:[%s615_s3 + $0x18] sm:$0xff]  ;;  %v82_v11 = vld [vmem:[%s615_s3 + $0x28] sm:$0xff]  ;;  %vm264_vm1 = vcmask 15360  }
   0x3   :  { %v378_v5 = vpack.c.bf16 %v78_v4, %v77_v3  ;;  %377 = vmatprep.subr.bf16.mxu0 %v439_v8  ;;  %401 = vmatprep.subr.bf16.mxu1 %v439_v8  ;;  %v381_v9 = vpack.c.bf16 %v80_v7, %v79_v6  ;;  %v81_v10 = vld [vmem:[%s615_s3 + $0x20] sm:$0xff]  ;;  %v83_v15 = vld [vmem:[%s615_s3 + $0x30] sm:$0xff]  ;;  %v84_v16 = vld [vmem:[%s615_s3 + $0x38] sm:$0xff]  ;;  %v34_v53 = vshrl.u32 %v33_v52, 7 }
   0x4   :  { %v384_v14 = vpack.c.bf16 %v82_v11, %v81_v10  ;;  %v387_v17 = vpack.c.bf16 %v84_v16, %v83_v15  ;;  %v85_v18 = vld [vmem:[%s615_s3 + $0x40] sm:$0xff]  ;;  %v86_v19 = vld [vmem:[%s615_s3 + $0x48] sm:$0xff]  ;;  %339 = vmatprep.mubr.msk.f32.mxu0 %vm442_vm0, %v443_v20  ;;  %374 = vmatprep.mubr.msk.f32.mxu1 %vm442_vm0, %v443_v20  ;;  %v87_v22 = vld [vmem:[%s615_s3 + $0x50] sm:$0xff] }
   0x5   :  { %379 = vmatpush3.bf16.msra.mxu0 %v378_v5  ;;  %v390_v21 = vpack.c.bf16 %v86_v19, %v85_v18  ;;  %v88_v23 = vld [vmem:[%s615_s3 + $0x58] sm:$0xff]  ;;  %v171_v25 = vld [vmem:[%s616_s5] sm:$0xff]  ;;  %v172_v26 = vld [vmem:[%s616_s5 + $0x8] sm:$0xff]  ;;  %v35_v54 = vsub.s32 0, %v34_v53  ;;  %v44_v55 = vsub.s32 1, %v34_v53  ;;  %v54_v58 = vsub.s32 2, %v34_v53 }
   0x6   :  { %380 = vmatprep.subr.bf16.mxu0 %v439_v8  ;;  %433 = vset.pattern.permute.xlu0 %v440_v12  ;;  %v393_v24 = vpack.c.bf16 %v88_v23, %v87_v22  ;;  %v173_v27 = vld [vmem:[%s616_s5 + $0x10] sm:$0xff]  ;;  %v89_v28 = vld [vmem:[%s615_s3 + $0x60] sm:$0xff]  ;;  %v90_v29 = vld [vmem:[%s615_s3 + $0x68] sm:$0xff]  ;;  %v402_v30 = vpack.c.bf16 %v172_v26, %v171_v25  ;;  %v64_v60 = vsub.s32 3, %v34_v53 }
   0x7   :  { %435 = vset.pattern.permute.xlu1 %v441_v13  ;;  %39 = vperm.xlu0 %433, %v26_v1   ;;  %v174_v31 = vld [vmem:[%s616_s5 + $0x18] sm:$0xff]  ;;  %v396_v33 = vpack.c.bf16 %v90_v29, %v89_v28  ;;  %v175_v34 = vld [vmem:[%s616_s5 + $0x20] sm:$0xff]  ;;  %v176_v35 = vld [vmem:[%s616_s5 + $0x28] sm:$0xff] }
   0x8   :  { %59 = vperm.xlu1 %435, %v26_v1   ;;  %403 = vmatpush3.bf16.msra.mxu1 %v402_v30  ;;  %v405_v32 = vpack.c.bf16 %v174_v31, %v173_v27  ;;  %v91_v36 = vld [vmem:[%s615_s3 + $0x70] sm:$0xff]  ;;  %v92_v37 = vld [vmem:[%s615_s3 + $0x78] sm:$0xff]  ;;  %v408_v38 = vpack.c.bf16 %v176_v35, %v175_v34  ;;  %v179_v43 = vld [vmem:[%s616_s5 + $0x40] sm:$0xff] }
   0x9   :  { %382 = vmatpush3.bf16.msra.mxu0 %v381_v9  ;;  %404 = vmatprep.subr.bf16.mxu1 %v439_v8  ;;  %v399_v39 = vpack.c.bf16 %v92_v37, %v91_v36  ;;  %v177_v40 = vld [vmem:[%s616_s5 + $0x30] sm:$0xff]  ;;  %v178_v41 = vld [vmem:[%s616_s5 + $0x38] sm:$0xff]  ;;  %v180_v44 = vld [vmem:[%s616_s5 + $0x48] sm:$0xff] }
   0xa   :  { %383 = vmatprep.subr.bf16.mxu0 %v439_v8  ;;  %v411_v42 = vpack.c.bf16 %v178_v41, %v177_v40  ;;  %v414_v45 = vpack.c.bf16 %v180_v44, %v179_v43  ;;  %v181_v46 = vld [vmem:[%s616_s5 + $0x50] sm:$0xff]  ;;  %v182_v47 = vld [vmem:[%s616_s5 + $0x58] sm:$0xff]  ;;  %v183_v49 = vld [vmem:[%s616_s5 + $0x60] sm:$0xff] }
   0xb   :  { %436 = vset.pattern.permute.xlu0 %v441_v13  ;;  %v417_v48 = vpack.c.bf16 %v182_v47, %v181_v46  ;;  %v184_v50 = vld [vmem:[%s616_s5 + $0x68] sm:$0xff]  ;;  %v27_v56 = vld [vmem:[%s617_s1] sm:$0xf]  ;;  %v185_v13 = vld [vmem:[%s616_s5 + $0x70] sm:$0xff] }
   0xc   :  { %406 = vmatpush3.bf16.msra.mxu1 %v405_v32  ;;  %v420_v51 = vpack.c.bf16 %v184_v50, %v183_v49  ;;  %v36_v61 = vrot.slane %v27_v56, %v35_v54  ;;  %v45_v62 = vrot.slane %v27_v56, %v44_v55  ;;  %v55_v63 = vrot.slane %v27_v56, %v54_v58  ;;  %v270_v9 = vld [vmem:[%s618_s2] ss:$0 sm:$0xff] }
   0xd   :  { %385 = vmatpush3.bf16.msra.mxu0 %v384_v14  ;;  %407 = vmatprep.subr.bf16.mxu1 %v439_v8  ;;  %v65_v0 = vrot.slane %v27_v56, %v64_v60  ;;  %v186_v14 = vld [vmem:[%s616_s5 + $0x78] sm:$0xff]  ;;  %v271_v16 = vld [vmem:[%s619_s4] ss:$0 sm:$0xff] }
   0xe   :  { %386 = vmatprep.subr.bf16.mxu0 %v439_v8  ;;  %v423_v15 = vpack.c.bf16 %v186_v14, %v185_v13 }
  0x10   :  { %409 = vmatpush3.bf16.msra.mxu1 %v408_v38 }
  0x11   :  { %388 = vmatpush3.bf16.msra.mxu0 %v387_v17  ;;  %410 = vmatprep.subr.bf16.mxu1 %v439_v8 }
  0x12   :  { %389 = vmatprep.subr.bf16.mxu0 %v439_v8 }
  0x14   :  { %412 = vmatpush3.bf16.msra.mxu1 %v411_v42 }
  0x15   :  { %391 = vmatpush3.bf16.msra.mxu0 %v390_v21  ;;  %413 = vmatprep.subr.bf16.mxu1 %v439_v8  ;;  %v272_v21 = vld [vmem:[%s620_s6] ss:$0 sm:$0xff] }
  0x16   :  { %392 = vmatprep.subr.bf16.mxu0 %v439_v8 }
  0x18   :  { %415 = vmatpush3.bf16.msra.mxu1 %v414_v45 }
  0x19   :  { %394 = vmatpush3.bf16.msra.mxu0 %v393_v24  ;;  %416 = vmatprep.subr.bf16.mxu1 %v439_v8 }
  0x1a   :  { %395 = vmatprep.subr.bf16.mxu0 %v439_v8 }
  0x1c   :  { %418 = vmatpush3.bf16.msra.mxu1 %v417_v48 }
  0x1d   :  { %397 = vmatpush3.bf16.msra.mxu0 %v396_v33  ;;  %419 = vmatprep.subr.bf16.mxu1 %v439_v8 }
  0x1e   :  { %398 = vmatprep.subr.bf16.mxu0 %v439_v8 }
  0x20   :  { %421 = vmatpush3.bf16.msra.mxu1 %v420_v51 }
  0x21   :  { %400 = vmatpush3.bf16.msra.mxu0 %v399_v39  ;;  %422 = vmatprep.subr.bf16.mxu1 %v439_v8 }
  0x24   :  { %424 = vmatpush3.bf16.msra.mxu1 %v423_v15 }
  0x81   :  { %v31_v57 = vpop.permute.xlu0 %30  ;;  %v50_v59 = vpop.permute.xlu1 %49 }
  0x82   :  { %v37_v3 = vmul.f32 %v36_v61, %v31_v57  ;;  %v56_v5 = vmul.f32 %v55_v63, %v50_v59 }
  0x86   :  { %v40_v1 = vpop.permute.xlu0 %39 }
  0x87   :  { %v60_v2 = vpop.permute.xlu1 %59  ;;  %v46_v4 = vmul.f32 %v45_v62, %v40_v1 }
  0x88   :  { %v66_v7 = vmul.f32 %v65_v0, %v60_v2 }
  0x89   :  { %v47_v6 = vadd.f32 %v46_v4, %v37_v3 }
  0x8b   :  { %v57_v8 = vadd.f32 %v56_v5, %v47_v6 }
  0x8d   :  { %v67_v10 = vadd.f32 %v66_v7, %v57_v8 }
  0x8f   :  { %v75_v11 = vadd.f32 %v270_v9, %v67_v10 }
  0x91   :  { %v76_v12 = vmax.f32 %v75_v11, 0.0 }
  0x93   :  { %340 = vmatmul.mubr.f32.vlgmr.msra.gmra.mrb[0].mxu0 %v76_v12 }
 0x166   :  { %v166_v17 = vpop.f32.mrb[0].mxu0 }
 0x167   :  { %v167_v18 = vadd.f32 %v271_v16, %v166_v17  ;;  %v341_v19 = vpop.f32.mrb[1].mxu0 }
 0x169   :  { %v170_v20 = vmax.f32 %v167_v18, 0.0 }
 0x16b   :  { %375 = vmatmul.mubr.f32.vlgmr.msra.gmra.mrb[0].mxu1 %v170_v20 }
 0x23e   :  { %v260_v22 = vpop.f32.mrb[0].mxu1 }
 0x23f   :  { %v261_v23 = vadd.f32 %v272_v21, %v260_v22  ;;  %v376_v24 = vpop.f32.mrb[1].mxu1 }
 0x241   :  { %265 = vst.msk [vmem:[%s621_s7] sm:$0xff] %vm264_vm1, %v261_v23 }

</bundles_post_ra>
